<compile_context>
chip_gen: v7x
topology: tpu7x:2x2x1
jax: 0.10.0
libtpu: 0.0.40
codegen_flags: <defaults>
</compile_context>

<pallas_src>
import functools

import jax
import jax.numpy as jnp
from jax.experimental import pallas as pl
from jax.experimental.pallas import tpu as pltpu


def _head_kernel(h_ref, w1_ref, b1_ref, w2_ref, b2_ref, emb_ref, pool_ref,
                 *, nb, n_tokens):
    """One row tile covering `nb` whole batches (nb * n_tokens token rows).

    h_ref:    (nb, D, N) f32   backbone feature tile, original 'b d n' layout
    w1_ref:   (D, D) f32       b1_ref: (1, D) f32
    w2_ref:   (D, E) f32       b2_ref: (1, E) f32
    emb_ref:  (1, nb*N, E) f32 out_emb row tile
    pool_ref: (1, nb, E)  f32  out_pool row tile
    """
    # Fused rearrange 'b d n -> (b n) d': per-batch 2-D f32 transpose (XLU) +
    # sublane concat + a single bf16 cast, all in VMEM.  nb is a small static
    # number (rows per tile are capped), so this loop fully unrolls.
    if nb > 1:
        h_rows = jnp.concatenate([h_ref[j].T for j in range(nb)], axis=0)
    else:
        h_rows = h_ref[0].T
    h_bf = h_rows.astype(jnp.bfloat16)                         # (nb*N, D)

    w1 = w1_ref[...].astype(jnp.bfloat16)
    w2 = w2_ref[...].astype(jnp.bfloat16)

    # dense_l1 + ReLU: bf16 MXU matmul, f32 accumulation; bias/ReLU on the VPU.
    x = jnp.dot(h_bf, w1, preferred_element_type=jnp.float32)  # (nb*N, D)
    x = jnp.maximum(x + b1_ref[...], 0.0)

    # dense_l2: bf16 MXU matmul, f32 accumulate, f32 bias add.
    y = jnp.dot(x.astype(jnp.bfloat16), w2,
                preferred_element_type=jnp.float32)            # (nb*N, E)
    y = y + b2_ref[...]

    # Lane-dense (rows, 768) store.
    # TODO(synk): emit bf16 here if the consumer tolerates it (halves the
    # dominant writeback on v5e's single vector-store slot).
    emb_ref[0] = y.astype(emb_ref.dtype)

    # Per-batch token mean: one grouped sublane reduce + one unmasked store.
    e = y.shape[-1]
    inv_n = 1.0 / float(n_tokens)
    pool = jnp.sum(y.reshape(nb, n_tokens, e), axis=1) * inv_n  # (nb, E)
    pool_ref[0] = pool.astype(pool_ref.dtype)


def _pick_batches_per_tile(batch, n_tokens, *, target_rows=512, max_rows=1024):
    """Whole-batch row-tile size (rows per tile = nb * n_tokens).

    - Tiny problems (< 2*target_rows total rows) run as one fat step: per-step
      overhead (~0.35us) and a cold pipeline would dominate.
    - Otherwise tile so every tile has <= max_rows rows (bounded VMEM, DMA /
      compute overlap) and there are >= 2 tiles (both v7x TensorCores get work
      on the "parallel" grid axis).  Row-count alignment (x8), not batch
      alignment, is what matters; the 3-D output blocks mean even unaligned
      row counts still compile.
    """
    total_rows = batch * n_tokens
    if total_rows < 2 * target_rows:
        return batch

    divisors = [d for d in range(batch // 2, 0, -1) if batch % d == 0]
    for d in divisors:                        # aligned and within [target, max]
        rows = d * n_tokens
        if rows <= max_rows and rows >= target_rows and rows % 8 == 0:
            return d
    for d in divisors:                        # any aligned tile <= max_rows
        rows = d * n_tokens
        if rows <= max_rows and rows % 8 == 0:
            return d
    for d in divisors:                        # any tile <= max_rows
        if d * n_tokens <= max_rows:
            return d
    # A single batch already exceeds max_rows.
    # TODO(synk): split within a batch with a pooling accumulator across steps.
    return 1


def _vmem_limit_bytes(nb, tm, d, n, e):
    """Conservative VMEM budget: double-buffered streamed blocks + resident
    weights + in-kernel f32/bf16 intermediates, with headroom.  Clamped to a
    range that is safe on v7x (64 MiB physical) and v5e/v6e (128 MiB)."""
    def pad(v, m):
        return -(-v // m) * m
    f32 = 4
    h_blk = nb * pad(d, 8) * pad(n, 128) * f32
    emb_blk = pad(tm, 8) * pad(e, 128) * f32
    pool_blk = pad(nb, 8) * pad(e, 128) * f32
    weights = (pad(d, 8) * (pad(d, 128) + pad(e, 128))
               + 8 * (pad(d, 128) + pad(e, 128))) * f32
    need = 2 * (h_blk + emb_blk + pool_blk) + 2 * weights
    need += emb_blk + h_blk + pad(tm, 8) * pad(d, 128) * f32     # x, y, h^T
    return int(min(max(2 * need, 32 * 1024 * 1024), 48 * 1024 * 1024))


def model_dense_head(dense_fea, w1, b1, w2, b2):
    """dense_fea: (B, D, N1, N2) f32 backbone features.
    w1: (D, D), b1: (D,) or (1, D), w2: (D, E), b2: (E,) or (1, E).
    Returns (out_emb (B, N, E), out_pool (B, E))."""
    B, D, N1, N2 = dense_fea.shape
    N = N1 * N2
    M = B * N
    E = w2.shape[1]

    # Free reshape only; the 'b d n -> (b n) d' rearrange happens in-kernel.
    h = dense_fea.reshape(B, D, N)
    w1f = jnp.asarray(w1, jnp.float32)
    w2f = jnp.asarray(w2, jnp.float32)
    b1f = jnp.asarray(b1, jnp.float32).reshape(1, D)
    b2f = jnp.asarray(b2, jnp.float32).reshape(1, E)

    nb = _pick_batches_per_tile(B, N)
    tiles = B // nb
    tm = nb * N

    kernel = functools.partial(_head_kernel, nb=nb, n_tokens=N)

    flops = 2 * M * D * (D + E)
    bytes_accessed = (M * D * 4                       # feature read (f32)
                      + (D * (D + E) + D + E) * 4     # weights + biases
                      + M * E * 4                     # emb write
                      + B * E * 4)                    # pool write

    out_emb, out_pool = pl.pallas_call(
        kernel,
        out_shape=(
            jax.ShapeDtypeStruct((tiles, tm, E), jnp.float32),
            jax.ShapeDtypeStruct((tiles, nb, E), jnp.float32),
        ),
        grid_spec=pltpu.PrefetchScalarGridSpec(
            num_scalar_prefetch=0,
            grid=(tiles,),
            in_specs=[
                pl.BlockSpec((nb, D, N), lambda i: (i, 0, 0)),   # features f32
                pl.BlockSpec((D, D), lambda i: (0, 0)),          # W1 resident
                pl.BlockSpec((1, D), lambda i: (0, 0)),          # b1
                pl.BlockSpec((D, E), lambda i: (0, 0)),          # W2 resident
                pl.BlockSpec((1, E), lambda i: (0, 0)),          # b2
            ],
            out_specs=[
                pl.BlockSpec((1, tm, E), lambda i: (i, 0, 0)),   # emb row tile
                pl.BlockSpec((1, nb, E), lambda i: (i, 0, 0)),   # pool row tile
            ],
        ),
        compiler_params=pltpu.CompilerParams(
            dimension_semantics=("parallel",),
            vmem_limit_bytes=_vmem_limit_bytes(nb, tm, D, N, E)),
        cost_estimate=pl.CostEstimate(
            flops=flops, transcendentals=0, bytes_accessed=bytes_accessed),
    )(h, w1f, b1f, w2f, b2f)

    return out_emb.reshape(B, N, E), out_pool.reshape(B, E)


if __name__ == "__main__":
    # Small shapes consistent with the forward:
    #   batch B=2, num_ftrs D=128 (densenet classifier in_features stand-in),
    #   spatial n1=n2=4 -> N=16 tokens, output embedding E=768 (as in module).
    B, D, N1, N2, E = 2, 128, 4, 4, 768
    N = N1 * N2

    key = jax.random.PRNGKey(0)
    k_fea, k_w1, k_b1, k_w2, k_b2 = jax.random.split(key, 5)

    # Deterministic synthetic densenet feature map (backbone not translated).
    dense_fea = jax.random.normal(k_fea, (B, D, N1, N2), dtype=jnp.float32)

    # dense_l1 (D->D) and dense_l2 (D->E) parameters.  PyTorch Linear stores W
    # as (out, in) and computes x @ W^T + b; here we store (in, out) directly.
    w1 = jax.random.normal(k_w1, (D, D), dtype=jnp.float32) * 0.02
    b1 = jax.random.normal(k_b1, (1, D), dtype=jnp.float32) * 0.02
    w2 = jax.random.normal(k_w2, (D, E), dtype=jnp.float32) * 0.02
    b2 = jax.random.normal(k_b2, (1, E), dtype=jnp.float32) * 0.02

    out_emb, out_pool = model_dense_head(dense_fea, w1, b1, w2, b2)
    jax.block_until_ready((out_emb, out_pool))

    # Pure-JAX reference using the same bf16 matmul operands / f32 accumulation
    # as the kernel (so the check validates kernel structure, not quantization).
    h32 = jnp.transpose(dense_fea, (0, 2, 3, 1)).reshape(B * N, D)
    hb = h32.astype(jnp.bfloat16)
    x_ref = jnp.maximum(
        jnp.dot(hb, w1.astype(jnp.bfloat16),
                preferred_element_type=jnp.float32) + b1, 0.0)
    y_ref = jnp.dot(x_ref.astype(jnp.bfloat16), w2.astype(jnp.bfloat16),
                    preferred_element_type=jnp.float32) + b2
    emb_ref = y_ref.reshape(B, N, E)
    pool_ref = jnp.mean(emb_ref, axis=1)

    assert out_emb.shape == (B, N, E)
    assert out_pool.shape == (B, E)
    assert jnp.allclose(out_emb, emb_ref, atol=2e-3, rtol=2e-3)
    assert jnp.allclose(out_pool, pool_ref, atol=2e-3, rtol=2e-3)

    print("KERNEL_OK")
</pallas_src>

<mosaic_0001>
module attributes {stable_mosaic.version = 11 : i64} {
  func.func @_head_kernel(%arg0: i32, %arg1: memref<2x128x16xf32, #tpu.memory_space<vmem>>, %arg2: memref<128x128xf32, #tpu.memory_space<vmem>>, %arg3: memref<1x128xf32, #tpu.memory_space<vmem>>, %arg4: memref<128x768xf32, #tpu.memory_space<vmem>>, %arg5: memref<1x768xf32, #tpu.memory_space<vmem>>, %arg6: memref<1x32x768xf32, #tpu.memory_space<vmem>>, %arg7: memref<1x2x768xf32, #tpu.memory_space<vmem>>) attributes {dimension_semantics = [#tpu.dimension_semantics<parallel>], iteration_bounds = array<i64: 1>, scalar_prefetch = 0 : i64, scratch_operands = 0 : i64, tpu.core_type = #tpu.core_type<tc>, window_params = [{transform_indices = @transform_0, window_bounds = array<i64: 2, 128, 16>}, {pipeline_mode = #tpu.pipeline_mode<synchronous>, transform_indices = @transform_1, window_bounds = array<i64: 128, 128>}, {pipeline_mode = #tpu.pipeline_mode<synchronous>, transform_indices = @transform_2, window_bounds = array<i64: 1, 128>}, {pipeline_mode = #tpu.pipeline_mode<synchronous>, transform_indices = @transform_3, window_bounds = array<i64: 128, 768>}, {pipeline_mode = #tpu.pipeline_mode<synchronous>, transform_indices = @transform_4, window_bounds = array<i64: 1, 768>}, {transform_indices = @transform_5, window_bounds = array<i64: 1, 32, 768>}, {transform_indices = @transform_6, window_bounds = array<i64: 1, 2, 768>}]} {
    %c0 = arith.constant 0 : index
    %c0_0 = arith.constant 0 : index
    %c0_1 = arith.constant 0 : index
    %0 = vector.load %arg1[%c0, %c0_0, %c0_1] : memref<2x128x16xf32, #tpu.memory_space<vmem>>, vector<1x128x16xf32>
    %1 = vector.shape_cast %0 : vector<1x128x16xf32> to vector<128x16xf32>
    %2 = tpu.transpose %1, [1, 0] : vector<128x16xf32> -> vector<16x128xf32>
    %c1 = arith.constant 1 : index
    %c0_2 = arith.constant 0 : index
    %c0_3 = arith.constant 0 : index
    %3 = vector.load %arg1[%c1, %c0_2, %c0_3] : memref<2x128x16xf32, #tpu.memory_space<vmem>>, vector<1x128x16xf32>
    %4 = vector.shape_cast %3 : vector<1x128x16xf32> to vector<128x16xf32>
    %5 = tpu.transpose %4, [1, 0] : vector<128x16xf32> -> vector<16x128xf32>
    %6 = tpu.concatenate %2, %5 in 0 : vector<16x128xf32>, vector<16x128xf32> -> vector<32x128xf32>
    %7 = arith.truncf %6 : vector<32x128xf32> to vector<32x128xbf16>
    %c0_4 = arith.constant 0 : index
    %c0_5 = arith.constant 0 : index
    %8 = vector.load %arg2[%c0_4, %c0_5] : memref<128x128xf32, #tpu.memory_space<vmem>>, vector<128x128xf32>
    %9 = arith.truncf %8 : vector<128x128xf32> to vector<128x128xbf16>
    %c0_6 = arith.constant 0 : index
    %c0_7 = arith.constant 0 : index
    %10 = vector.load %arg4[%c0_6, %c0_7] : memref<128x768xf32, #tpu.memory_space<vmem>>, vector<128x768xf32>
    %11 = arith.truncf %10 : vector<128x768xf32> to vector<128x768xbf16>
    %cst = arith.constant dense<0.000000e+00> : vector<32x128xf32>
    %12 = tpu.matmul %7, %9, %cst {dimension_numbers = #tpu.dot_dimension_numbers<[1], [0], [0], [1], [0, 0, 1, 1], [], []>} : vector<32x128xbf16>, vector<128x128xbf16>, vector<32x128xf32> -> vector<32x128xf32>
    %c0_8 = arith.constant 0 : index
    %c0_9 = arith.constant 0 : index
    %13 = vector.load %arg3[%c0_8, %c0_9] : memref<1x128xf32, #tpu.memory_space<vmem>>, vector<1x128xf32>
    %14 = vector.broadcast %13 : vector<1x128xf32> to vector<32x128xf32>
    %15 = arith.addf %12, %14 : vector<32x128xf32>
    %cst_10 = arith.constant 0.000000e+00 : f32
    %16 = vector.broadcast %cst_10 : f32 to vector<32x128xf32>
    %17 = arith.maximumf %15, %16 : vector<32x128xf32>
    %18 = arith.truncf %17 : vector<32x128xf32> to vector<32x128xbf16>
    %cst_11 = arith.constant dense<0.000000e+00> : vector<32x768xf32>
    %19 = tpu.matmul %18, %11, %cst_11 {dimension_numbers = #tpu.dot_dimension_numbers<[1], [0], [0], [1], [0, 0, 1, 1], [], []>} : vector<32x128xbf16>, vector<128x768xbf16>, vector<32x768xf32> -> vector<32x768xf32>
    %c0_12 = arith.constant 0 : index
    %c0_13 = arith.constant 0 : index
    %20 = vector.load %arg5[%c0_12, %c0_13] : memref<1x768xf32, #tpu.memory_space<vmem>>, vector<1x768xf32>
    %21 = vector.broadcast %20 : vector<1x768xf32> to vector<32x768xf32>
    %22 = arith.addf %19, %21 : vector<32x768xf32>
    %c0_14 = arith.constant 0 : index
    %c0_15 = arith.constant 0 : index
    %c0_16 = arith.constant 0 : index
    %23 = vector.load %arg6[%c0_14, %c0_15, %c0_16] : memref<1x32x768xf32, #tpu.memory_space<vmem>>, vector<1x32x768xf32>
    %24 = vector.shape_cast %23 : vector<1x32x768xf32> to vector<32x768xf32>
    %25 = vector.shape_cast %22 : vector<32x768xf32> to vector<1x32x768xf32>
    tpu.vector_store %arg6[%c0_14, %c0_15, %c0_16], %25 {strides = array<i32>} : memref<1x32x768xf32, #tpu.memory_space<vmem>>, vector<1x32x768xf32>,
    %26 = vector.shape_cast %22 : vector<32x768xf32> to vector<2x16x768xf32>
    %cst_17 = arith.constant dense<0.000000e+00> : vector<2x768xf32>
    %27 = vector.multi_reduction <add>, %26, %cst_17 [1] : vector<2x16x768xf32> to vector<2x768xf32>
    %cst_18 = arith.constant 6.250000e-02 : f32
    %28 = vector.broadcast %cst_18 : f32 to vector<2x768xf32>
    %29 = arith.mulf %27, %28 : vector<2x768xf32>
    %c0_19 = arith.constant 0 : index
    %c0_20 = arith.constant 0 : index
    %c0_21 = arith.constant 0 : index
    %30 = vector.load %arg7[%c0_19, %c0_20, %c0_21] : memref<1x2x768xf32, #tpu.memory_space<vmem>>, vector<1x2x768xf32>
    %31 = vector.shape_cast %30 : vector<1x2x768xf32> to vector<2x768xf32>
    %32 = vector.shape_cast %29 : vector<2x768xf32> to vector<1x2x768xf32>
    tpu.vector_store %arg7[%c0_19, %c0_20, %c0_21], %32 {strides = array<i32>} : memref<1x2x768xf32, #tpu.memory_space<vmem>>, vector<1x2x768xf32>,
    return
  }
  func.func @transform_0(%arg0: i32) -> (i32, i32, i32) {
    %c0_i32 = arith.constant 0 : i32
    %c0_i32_0 = arith.constant 0 : i32
    %c0_i32_1 = arith.constant 0 : i32
    return %arg0, %c0_i32, %c0_i32_0 : i32, i32, i32
  }
  func.func @transform_1(%arg0: i32) -> (i32, i32) {
    %c0_i32 = arith.constant 0 : i32
    %c0_i32_0 = arith.constant 0 : i32
    %c0_i32_1 = arith.constant 0 : i32
    return %c0_i32, %c0_i32_0 : i32, i32
  }
  func.func @transform_2(%arg0: i32) -> (i32, i32) {
    %c0_i32 = arith.constant 0 : i32
    %c0_i32_0 = arith.constant 0 : i32
    %c0_i32_1 = arith.constant 0 : i32
    return %c0_i32, %c0_i32_0 : i32, i32
  }
  func.func @transform_3(%arg0: i32) -> (i32, i32) {
    %c0_i32 = arith.constant 0 : i32
    %c0_i32_0 = arith.constant 0 : i32
    %c0_i32_1 = arith.constant 0 : i32
    return %c0_i32, %c0_i32_0 : i32, i32
  }
  func.func @transform_4(%arg0: i32) -> (i32, i32) {
    %c0_i32 = arith.constant 0 : i32
    %c0_i32_0 = arith.constant 0 : i32
    %c0_i32_1 = arith.constant 0 : i32
    return %c0_i32, %c0_i32_0 : i32, i32
  }
  func.func @transform_5(%arg0: i32) -> (i32, i32, i32) {
    %c0_i32 = arith.constant 0 : i32
    %c0_i32_0 = arith.constant 0 : i32
    %c0_i32_1 = arith.constant 0 : i32
    return %arg0, %c0_i32, %c0_i32_0 : i32, i32, i32
  }
  func.func @transform_6(%arg0: i32) -> (i32, i32, i32) {
    %c0_i32 = arith.constant 0 : i32
    %c0_i32_0 = arith.constant 0 : i32
    %c0_i32_1 = arith.constant 0 : i32
    return %arg0, %c0_i32, %c0_i32_0 : i32, i32, i32
  }
}

</mosaic_0001>

<bundles_post_ra>
// kernel: tpu_custom_call.1
= control target key start
LH: loop header
LB: loop body
LE: loop exit
PB: predicated region body
PF: predicated region fallthrough
CT: control target
= control target key end

     0   :  { %12 = vsyncpa [#allocation3], 0  ;;  %s1254_s0 = inlined_call_operand.vmem [shape: f32[2,128,16], index: 0, kind: input, shape index: {}]   ;;  %s1255_s1 = inlined_call_operand.vmem [shape: f32[128,128], index: 1, kind: input, shape index: {}]   ;;  %s1256_s2 = inlined_call_operand.vmem [shape: f32[1,128], index: 2, kind: input, shape index: {}]   ;;  %s1257_s3 = inlined_call_operand.hbm [shape: f32[128,768], index: 3, kind: input, shape index: {}]   ;;  %s1258_s4 = inlined_call_operand.vmem [shape: f32[1,768], index: 4, kind: input, shape index: {}]   ;;  %s1259_s5 = inlined_call_operand.hbm [shape: f32[1,32,768], index: 5, kind: output, shape index: {0}]   ;;  %s1260_s6 = inlined_call_operand.hbm [shape: f32[1,2,768], index: 6, kind: output, shape index: {1}]  }
   0x1   :  { %13 = vsyncpa [#allocation4], 0 }
   0x2   :  { %14 = vsyncpa [#allocation7], 0  ;;  %s964_s21 = smov [#allocation2]   ;;  %s892_s25 = scalar_lea.hbm %s1257_s3, 12288 }
   0x3   :  { %s26_s22 = sshll.u32 %s964_s21, 4  ;;  %p893_p0 = scmp.ne.s32.totalorder %s1257_s3, %s892_s25  ;;  %s27_s22 = int_to_ptr.vmem [resolvable:$true] %s26_s22 }
   0x4   :  { %p896_p1 = scmp.lt.u32.totalorder %s892_s25, %s1257_s3 }
   0x6   :  { %p898_p2 = pnand %p896_p1, %p893_p0 }
   0x8   :  { %901 = shalt.err (!%p898_p2)
}
   0x9   :  { %s902_s30 = scalar_lea.vmem %s27_s22, 12288  ;;  %p907_p4 = scmp.lt.s32.totalorder %s27_s22, %s27_s22 }
   0xa   :  { %p903_p3 = scmp.ne.s32.totalorder %s27_s22, %s902_s30  ;;  %p908_p5 = scmp.lt.s32.totalorder %s902_s30, %s902_s30 }
   0xc   :  { %p909_p6 = por %p908_p5, %p907_p4 }
   0xe   :  { %p910_p7 = pnand %p909_p6, %p903_p3 }
  0x10   :  { %913 = shalt.err (!%p910_p7)
}
  0x11   :  { %s965_s7 = smov 768   ;;  %s966_s8 = smov 48  }
  0x12   :  { %32 = dma.hbm_to_vmem [thread:$0]  %s1257_s3, 12288, %s27_s22, [#allocation3], %s965_s7, %s965_s7, %s966_s8  }
  0x13   :  { %958 = dma.done.wait [#allocation3], 12288  }
  0x14   :  { %959 = vsyncadd [#allocation3], 4294955008  ;;  %v39_v0 = vld [vmem:[%s1254_s0] sm:$0xff]  ;;  %v40_v2 = vld [vmem:[%s1254_s0 + $0x8] sm:$0xff]  ;;  %vm746_vm0 = vcmask 1041409   ;;  %vm748_vm1 = vcmask 1043459  }
  0x15   :  { %v796_v1 = vld [vmem:[%s1254_s0 + $0x80] sm:$0xff]  ;;  %v797_v4 = vld [vmem:[%s1254_s0 + $0x88] sm:$0xff]  ;;  %v41_v6 = vld [vmem:[%s1254_s0 + $0x10] sm:$0xff]  ;;  %vm750_vm2 = vcmask 1045509   ;;  %vm752_vm3 = vcmask 1047559  }
  0x16   :  { %v850_v3 = vpack.i.bf16 %v796_v1, %v39_v0  ;;  %v852_v5 = vpack.i.bf16 %v797_v4, %v40_v2  ;;  %v798_v7 = vld [vmem:[%s1254_s0 + $0x90] sm:$0xff]  ;;  %v42_v9 = vld [vmem:[%s1254_s0 + $0x18] sm:$0xff]  ;;  %v138_v11 = vld [vmem:[%s1255_s1] sm:$0xff] }
  0x17   :  { %v854_v8 = vpack.i.bf16 %v798_v7, %v41_v6  ;;  %v799_v10 = vld [vmem:[%s1254_s0 + $0x98] sm:$0xff]  ;;  %v139_v13 = vld [vmem:[%s1255_s1 + $0x8] sm:$0xff]  ;;  %v140_v14 = vld [vmem:[%s1255_s1 + $0x10] sm:$0xff] }
  0x18   :  { %851 = vxpose.xlu0.b32.start [1/16] (narrow) %v850_v3, 16  ;;  %v856_v12 = vpack.i.bf16 %v799_v10, %v42_v9  ;;  %v141_v15 = vld [vmem:[%s1255_s1 + $0x18] sm:$0xff]  ;;  %v43_v16 = vld [vmem:[%s1254_s0 + $0x20] sm:$0xff]  ;;  %v154_v18 = vpack.c.bf16 %v139_v13, %v138_v11  ;;  %v143_v21 = vld [vmem:[%s1255_s1 + $0x28] sm:$0xff] }
  0x19   :  { %v800_v17 = vld [vmem:[%s1254_s0 + $0xa0] sm:$0xff]  ;;  %v155_v19 = vpack.c.bf16 %v141_v15, %v140_v14  ;;  %v44_v23 = vld [vmem:[%s1254_s0 + $0x28] sm:$0xff]  ;;  %v169_v27 = vld [vmem:[#allocation2 + $0x38] sm:$0xff] }
  0x1a   :  { %v142_v20 = vld [vmem:[%s1255_s1 + $0x20] sm:$0xff]  ;;  %823 = vmatprep.subr.bf16.mxu0 %v154_v18  ;;  %v858_v22 = vpack.i.bf16 %v800_v17, %v43_v16  ;;  %v801_v24 = vld [vmem:[%s1254_s0 + $0xa8] sm:$0xff]  ;;  %v144_v29 = vld [vmem:[%s1255_s1 + $0x30] sm:$0xff] }
  0x1b   :  { %824 = vmatpush3.bf16.msra.mxu0 %v154_v18  ;;  %v156_v25 = vpack.c.bf16 %v143_v21, %v142_v20  ;;  %v163_v26 = vld [vmem:[#allocation2 + $0x8] sm:$0xff]  ;;  %v162_v28 = vld [vmem:[#allocation2] sm:$0xff]  ;;  %v145_v30 = vld [vmem:[%s1255_s1 + $0x38] sm:$0xff]  ;;  %v860_v35 = vpack.i.bf16 %v801_v24, %v44_v23 }
  0x1c   :  { %853 = vxpose.xlu0.b32.cont [2/16] (narrow) %v852_v5, 16  ;;  %825 = vmatprep.subr.bf16.mxu0 %v155_v19  ;;  %v259_v31 = vpack.c.bf16 %v169_v27, %v163_v26  ;;  %v168_v32 = vld [vmem:[#allocation2 + $0x30] sm:$0xff]  ;;  %v175_v34 = vld [vmem:[#allocation2 + $0x68] sm:$0xff]  ;;  %v181_v36 = vld [vmem:[#allocation2 + $0x98] sm:$0xff]  ;;  %v157_v41 = vpack.c.bf16 %v145_v30, %v144_v29 }
  0x1d   :  { %v258_v33 = vpack.c.bf16 %v168_v32, %v162_v28  ;;  %v174_v37 = vld [vmem:[#allocation2 + $0x60] sm:$0xff]  ;;  %v180_v38 = vld [vmem:[#allocation2 + $0x90] sm:$0xff]  ;;  %v265_v43 = vpack.c.bf16 %v181_v36, %v175_v34  ;;  %v147_v44 = vld [vmem:[%s1255_s1 + $0x48] sm:$0xff] }
  0x1e   :  { %v45_v39 = vld [vmem:[%s1254_s0 + $0x30] sm:$0xff]  ;;  %v146_v42 = vld [vmem:[%s1255_s1 + $0x40] sm:$0xff]  ;;  %400 = vmatprep.subr.bf16.mxu1 %v259_v31  ;;  %v264_v45 = vpack.c.bf16 %v180_v38, %v174_v37  ;;  %v187_v46 = vld [vmem:[#allocation2 + $0xc8] sm:$0xff] }
  0x1f   :  { %826 = vmatpush3.bf16.msra.mxu0 %v155_v19  ;;  %v802_v40 = vld [vmem:[%s1254_s0 + $0xb0] sm:$0xff]  ;;  %401 = vmatpush1.bf16.msra.mxu1 %v258_v33  ;;  %v193_v47 = vld [vmem:[#allocation2 + $0xf8] sm:$0xff]  ;;  %v186_v49 = vld [vmem:[#allocation2 + $0xc0] sm:$0xff]  ;;  %v158_v54 = vpack.c.bf16 %v147_v44, %v146_v42 }
  0x20   :  { %855 = vxpose.xlu0.b32.cont [3/16] (narrow) %v854_v8, 16  ;;  %827 = vmatprep.subr.bf16.mxu0 %v156_v25  ;;  %v271_v48 = vpack.c.bf16 %v193_v47, %v187_v46  ;;  %v192_v50 = vld [vmem:[#allocation2 + $0xf0] sm:$0xff]  ;;  %v862_v51 = vpack.i.bf16 %v802_v40, %v45_v39  ;;  %v46_v52 = vld [vmem:[%s1254_s0 + $0x38] sm:$0xff]  ;;  %v199_v55 = vld [vmem:[#allocation2 + $0x128] sm:$0xff] }
  0x21   :  { %402 = vmatprep.subr.bf16.mxu1 %v265_v43  ;;  %v803_v53 = vld [vmem:[%s1254_s0 + $0xb8] sm:$0xff]  ;;  %v148_v57 = vld [vmem:[%s1255_s1 + $0x50] sm:$0xff]  ;;  %v270_v59 = vpack.c.bf16 %v192_v50, %v186_v49  ;;  %v198_v61 = vld [vmem:[#allocation2 + $0x120] sm:$0xff] }
  0x22   :  { %v205_v56 = vld [vmem:[#allocation2 + $0x158] sm:$0xff]  ;;  %v204_v62 = vld [vmem:[#allocation2 + $0x150] sm:$0xff]  ;;  %v864_v63 = vpack.i.bf16 %v803_v53, %v46_v52  ;;  %v211_v0 = vld [vmem:[#allocation2 + $0x188] sm:$0xff] }
  0x23   :  { %828 = vmatpush3.bf16.msra.mxu0 %v156_v25  ;;  %v149_v58 = vld [vmem:[%s1255_s1 + $0x58] sm:$0xff]  ;;  %403 = vmatpush1.bf16.msra.mxu1 %v264_v45  ;;  %v277_v60 = vpack.c.bf16 %v205_v56, %v199_v55  ;;  %v47_v2 = vld [vmem:[%s1254_s0 + $0x40] sm:$0xff]  ;;  %v151_v6 = vld [vmem:[%s1255_s1 + $0x68] sm:$0xff]  ;;  %v276_v7 = vpack.c.bf16 %v204_v62, %v198_v61 }
  0x24   :  { %857 = vxpose.xlu0.b32.cont [4/16] (narrow) %v856_v12, 16  ;;  %829 = vmatprep.subr.bf16.mxu0 %v157_v41  ;;  %v217_v1 = vld [vmem:[#allocation2 + $0x1b8] sm:$0xff]  ;;  %v804_v3 = vld [vmem:[%s1254_s0 + $0xc0] sm:$0xff]  ;;  %v159_v4 = vpack.c.bf16 %v149_v58, %v148_v57  ;;  %v216_v10 = vld [vmem:[#allocation2 + $0x1b0] sm:$0xff] }
  0x25   :  { %404 = vmatprep.subr.bf16.mxu1 %v271_v48  ;;  %v150_v5 = vld [vmem:[%s1255_s1 + $0x60] sm:$0xff]  ;;  %v283_v8 = vpack.c.bf16 %v217_v1, %v211_v0  ;;  %v866_v11 = vpack.i.bf16 %v804_v3, %v47_v2  ;;  %v223_v12 = vld [vmem:[#allocation2 + $0x1e8] sm:$0xff]  ;;  %v229_v13 = vld [vmem:[#allocation2 + $0x218] sm:$0xff] }
  0x26   :  { %v210_v9 = vld [vmem:[#allocation2 + $0x180] sm:$0xff]  ;;  %v48_v14 = vld [vmem:[%s1254_s0 + $0x48] sm:$0xff]  ;;  %v160_v16 = vpack.c.bf16 %v151_v6, %v150_v5  ;;  %v152_v17 = vld [vmem:[%s1255_s1 + $0x70] sm:$0xff]  ;;  %v289_v20 = vpack.c.bf16 %v229_v13, %v223_v12 }
  0x27   :  { %830 = vmatpush3.bf16.msra.mxu0 %v157_v41  ;;  %405 = vmatpush1.bf16.msra.mxu1 %v270_v59  ;;  %v805_v15 = vld [vmem:[%s1254_s0 + $0xc8] sm:$0xff]  ;;  %v153_v18 = vld [vmem:[%s1255_s1 + $0x78] sm:$0xff]  ;;  %v282_v19 = vpack.c.bf16 %v216_v10, %v210_v9  ;;  %v222_v21 = vld [vmem:[#allocation2 + $0x1e0] sm:$0xff] }
  0x28   :  { %859 = vxpose.xlu0.b32.cont [5/16] (narrow) %v858_v22, 16  ;;  %831 = vmatprep.subr.bf16.mxu0 %v158_v54  ;;  %v228_v22 = vld [vmem:[#allocation2 + $0x210] sm:$0xff]  ;;  %v868_v23 = vpack.i.bf16 %v805_v15, %v48_v14  ;;  %v161_v26 = vpack.c.bf16 %v153_v18, %v152_v17  ;;  %v165_v27 = vld [vmem:[#allocation2 + $0x18] sm:$0xff]  ;;  %v171_v28 = vld [vmem:[#allocation2 + $0x48] sm:$0xff] }
  0x29   :  { %406 = vmatprep.subr.bf16.mxu1 %v277_v60  ;;  %v49_v24 = vld [vmem:[%s1254_s0 + $0x50] sm:$0xff]  ;;  %v288_v29 = vpack.c.bf16 %v228_v22, %v222_v21  ;;  %v50_v31 = vld [vmem:[%s1254_s0 + $0x58] sm:$0xff]  ;;  %v261_v33 = vpack.c.bf16 %v171_v28, %v165_v27  ;;  %v808_v36 = vld [vmem:[%s1254_s0 + $0xe0] sm:$0xff] }
  0x2a   :  { %v806_v25 = vld [vmem:[%s1254_s0 + $0xd0] sm:$0xff]  ;;  %v807_v32 = vld [vmem:[%s1254_s0 + $0xd8] sm:$0xff]  ;;  %v52_v38 = vld [vmem:[%s1254_s0 + $0x68] sm:$0xff] }
  0x2b   :  { %832 = vmatpush3.bf16.msra.mxu0 %v158_v54  ;;  %407 = vmatpush1.bf16.msra.mxu1 %v276_v7  ;;  %v870_v30 = vpack.i.bf16 %v806_v25, %v49_v24  ;;  %v872_v34 = vpack.i.bf16 %v807_v32, %v50_v31  ;;  %v809_v39 = vld [vmem:[%s1254_s0 + $0xe8] sm:$0xff]  ;;  %v53_v41 = vld [vmem:[%s1254_s0 + $0x70] sm:$0xff]  ;;  %v54_v44 = vld [vmem:[%s1254_s0 + $0x78] sm:$0xff] }
  0x2c   :  { %861 = vxpose.xlu0.b32.cont [6/16] (narrow) %v860_v35, 16  ;;  %833 = vmatprep.subr.bf16.mxu0 %v159_v4  ;;  %v51_v35 = vld [vmem:[%s1254_s0 + $0x60] sm:$0xff]  ;;  %v876_v40 = vpack.i.bf16 %v809_v39, %v52_v38  ;;  %v810_v42 = vld [vmem:[%s1254_s0 + $0xf0] sm:$0xff]  ;;  %v811_v45 = vld [vmem:[%s1254_s0 + $0xf8] sm:$0xff] }
  0x2d   :  { %408 = vmatprep.subr.bf16.mxu1 %v283_v8  ;;  %v874_v37 = vpack.i.bf16 %v808_v36, %v51_v35  ;;  %v878_v43 = vpack.i.bf16 %v810_v42, %v53_v41  ;;  %v880_v46 = vpack.i.bf16 %v811_v45, %v54_v44  ;;  %v170_v52 = vld [vmem:[#allocation2 + $0x40] sm:$0xff]  ;;  %v177_v55 = vld [vmem:[#allocation2 + $0x78] sm:$0xff]  ;;  %v183_v56 = vld [vmem:[#allocation2 + $0xa8] sm:$0xff] }
  0x2e   :  { %v267_v60 = vpack.c.bf16 %v183_v56, %v177_v55  ;;  %v176_v61 = vld [vmem:[#allocation2 + $0x70] sm:$0xff]  ;;  %v182_v62 = vld [vmem:[#allocation2 + $0xa0] sm:$0xff]  ;;  %v195_v0 = vld [vmem:[#allocation2 + $0x108] sm:$0xff] }
  0x2f   :  { %834 = vmatpush3.bf16.msra.mxu0 %v159_v4  ;;  %409 = vmatpush1.bf16.msra.mxu1 %v282_v19  ;;  %v266_v1 = vpack.c.bf16 %v182_v62, %v176_v61  ;;  %v188_v3 = vld [vmem:[#allocation2 + $0xd0] sm:$0xff]  ;;  %v194_v4 = vld [vmem:[#allocation2 + $0x100] sm:$0xff]  ;;  %v201_v5 = vld [vmem:[#allocation2 + $0x138] sm:$0xff] }
  0x30   :  { %863 = vxpose.xlu0.b32.cont [7/16] (narrow) %v862_v51, 16  ;;  %835 = vmatprep.subr.bf16.mxu0 %v160_v16  ;;  %v164_v51 = vld [vmem:[#allocation2 + $0x10] sm:$0xff]  ;;  %v207_v6 = vld [vmem:[#allocation2 + $0x168] sm:$0xff]  ;;  %v272_v7 = vpack.c.bf16 %v194_v4, %v188_v3  ;;  %v206_v10 = vld [vmem:[#allocation2 + $0x160] sm:$0xff] }
  0x31   :  { %410 = vmatprep.subr.bf16.mxu1 %v289_v20  ;;  %v260_v59 = vpack.c.bf16 %v170_v52, %v164_v51  ;;  %v279_v8 = vpack.c.bf16 %v207_v6, %v201_v5  ;;  %v200_v9 = vld [vmem:[#allocation2 + $0x130] sm:$0xff]  ;;  %v219_v12 = vld [vmem:[#allocation2 + $0x1c8] sm:$0xff]  ;;  %v225_v17 = vld [vmem:[#allocation2 + $0x1f8] sm:$0xff]  ;;  %v967_v51 = vmov 0  }
  0x32   :  { %v278_v13 = vpack.c.bf16 %v206_v10, %v200_v9  ;;  %v212_v15 = vld [vmem:[#allocation2 + $0x190] sm:$0xff]  ;;  %v231_v18 = vld [vmem:[#allocation2 + $0x228] sm:$0xff]  ;;  %v230_v22 = vld [vmem:[#allocation2 + $0x220] sm:$0xff]  ;;  %432 = vmatprep.mubr.bf16.mxu1 %v967_v51 }
  0x33   :  { %836 = vmatpush3.bf16.msra.mxu0 %v160_v16  ;;  %411 = vmatpush1.bf16.msra.mxu1 %v288_v29  ;;  %v218_v16 = vld [vmem:[#allocation2 + $0x1c0] sm:$0xff]  ;;  %v291_v20 = vpack.c.bf16 %v231_v18, %v225_v17  ;;  %v224_v21 = vld [vmem:[#allocation2 + $0x1f0] sm:$0xff]  ;;  %v235_v24 = vld [vmem:[#allocation2 + $0x248] sm:$0xff] }
  0x34   :  { %865 = vxpose.xlu0.b32.cont [8/16] (narrow) %v864_v63, 16  ;;  %837 = vmatprep.subr.bf16.mxu0 %v161_v26  ;;  %v189_v63 = vld [vmem:[#allocation2 + $0xd8] sm:$0xff]  ;;  %v284_v19 = vpack.c.bf16 %v218_v16, %v212_v15  ;;  %v234_v27 = vld [vmem:[#allocation2 + $0x240] sm:$0xff]  ;;  %v240_v28 = vld [vmem:[#allocation2 + $0x270] sm:$0xff] }
  0x35   :  { %v273_v2 = vpack.c.bf16 %v195_v0, %v189_v63  ;;  %v241_v25 = vld [vmem:[#allocation2 + $0x278] sm:$0xff]  ;;  %v243_v31 = vld [vmem:[#allocation2 + $0x288] sm:$0xff]  ;;  %v236_v32 = vld [vmem:[#allocation2 + $0x250] sm:$0xff] }
  0x36   :  { %v237_v29 = vld [vmem:[#allocation2 + $0x258] sm:$0xff]  ;;  %v247_v36 = vld [vmem:[#allocation2 + $0x2a8] sm:$0xff]  ;;  %v246_v39 = vld [vmem:[#allocation2 + $0x2a0] sm:$0xff] }
  0x37   :  { %838 = vmatpush3.bf16.msra.mxu0 %v161_v26  ;;  %v295_v26 = vpack.c.bf16 %v241_v25, %v235_v24  ;;  %v249_v41 = vld [vmem:[#allocation2 + $0x2b8] sm:$0xff]  ;;  %v248_v44 = vld [vmem:[#allocation2 + $0x2b0] sm:$0xff]  ;;  %v254_v45 = vld [vmem:[#allocation2 + $0x2e0] sm:$0xff] }
  0x38   :  { %867 = vxpose.xlu0.b32.cont [9/16] (narrow) %v866_v11, 16  ;;  %453 = vmatprep.subr.bf16.mxu0 %v261_v33  ;;  %v213_v11 = vld [vmem:[#allocation2 + $0x198] sm:$0xff]  ;;  %v297_v33 = vpack.c.bf16 %v243_v31, %v237_v29  ;;  %v812_v52 = vld [vmem:[%s1256_s2] ss:$0 sm:$0xff]  ;;  %v172_v62 = vld [vmem:[#allocation2 + $0x50] sm:$0xff] }
  0x39   :  { %v285_v14 = vpack.c.bf16 %v219_v12, %v213_v11  ;;  %412 = vmatprep.subr.bf16.mxu1 %v295_v26  ;;  %v166_v61 = vld [vmem:[#allocation2 + $0x20] sm:$0xff]  ;;  %v184_v10 = vld [vmem:[#allocation2 + $0xb0] sm:$0xff]  ;;  %v191_v11 = vld [vmem:[#allocation2 + $0xe8] sm:$0xff] }
  0x3a   :  { %v262_v6 = vpack.c.bf16 %v172_v62, %v166_v61  ;;  %v178_v9 = vld [vmem:[#allocation2 + $0x80] sm:$0xff]  ;;  %v197_v12 = vld [vmem:[#allocation2 + $0x118] sm:$0xff]  ;;  %v196_v16 = vld [vmem:[#allocation2 + $0x110] sm:$0xff]  ;;  %v968_v61 = vmov 1983009808  }
  0x3b   :  { %v190_v15 = vld [vmem:[#allocation2 + $0xe0] sm:$0xff]  ;;  %v203_v17 = vld [vmem:[#allocation2 + $0x148] sm:$0xff]  ;;  %v209_v18 = vld [vmem:[#allocation2 + $0x178] sm:$0xff]  ;;  %v694_v62 = vunpack.c.l.s4 %v968_v61 }
  0x3c   :  { %869 = vxpose.xlu0.b32.cont [10/16] (narrow) %v868_v23, 16  ;;  %v290_v23 = vpack.c.bf16 %v230_v22, %v224_v21  ;;  %v202_v21 = vld [vmem:[#allocation2 + $0x140] sm:$0xff]  ;;  %v208_v22 = vld [vmem:[#allocation2 + $0x170] sm:$0xff]  ;;  %v221_v24 = vld [vmem:[#allocation2 + $0x1d8] sm:$0xff] }
  0x3d   :  { %v280_v25 = vpack.c.bf16 %v208_v22, %v202_v21  ;;  %v227_v29 = vld [vmem:[#allocation2 + $0x208] sm:$0xff] }
  0x40   :  { %871 = vxpose.xlu0.b32.cont [11/16] (narrow) %v870_v30, 16  ;;  %v294_v30 = vpack.c.bf16 %v240_v28, %v234_v27  ;;  %v214_v27 = vld [vmem:[#allocation2 + $0x1a0] sm:$0xff]  ;;  %v220_v28 = vld [vmem:[#allocation2 + $0x1d0] sm:$0xff] }
  0x41   :  { %v286_v31 = vpack.c.bf16 %v220_v28, %v214_v27 }
  0x42   :  { %413 = vmatpush1.bf16.msra.mxu1 %v294_v30  ;;  %v233_v30 = vld [vmem:[#allocation2 + $0x238] sm:$0xff] }
  0x44   :  { %873 = vxpose.xlu0.b32.cont [12/16] (narrow) %v872_v34, 16  ;;  %v242_v34 = vld [vmem:[#allocation2 + $0x280] sm:$0xff] }
  0x45   :  { %v296_v35 = vpack.c.bf16 %v242_v34, %v236_v32  ;;  %v293_v32 = vpack.c.bf16 %v233_v30, %v227_v29  ;;  %v232_v34 = vld [vmem:[#allocation2 + $0x230] sm:$0xff] }
  0x48   :  { %875 = vxpose.xlu0.b32.cont [13/16] (narrow) %v874_v37, 16  ;;  %v253_v37 = vld [vmem:[#allocation2 + $0x2d8] sm:$0xff] }
  0x49   :  { %v301_v38 = vpack.c.bf16 %v253_v37, %v247_v36  ;;  %v245_v36 = vld [vmem:[#allocation2 + $0x298] sm:$0xff] }
  0x4b   :  { %414 = vmatprep.subr.bf16.mxu1 %v301_v38 }
  0x4c   :  { %877 = vxpose.xlu0.b32.cont [14/16] (narrow) %v876_v40, 16  ;;  %v252_v40 = vld [vmem:[#allocation2 + $0x2d0] sm:$0xff] }
  0x4d   :  { %v300_v42 = vpack.c.bf16 %v252_v40, %v246_v39  ;;  %v238_v39 = vld [vmem:[#allocation2 + $0x260] sm:$0xff]  ;;  %v244_v40 = vld [vmem:[#allocation2 + $0x290] sm:$0xff] }
  0x4f   :  { %415 = vmatpush1.bf16.msra.mxu1 %v300_v42  ;;  %v257_v42 = vld [vmem:[#allocation2 + $0x2f8] sm:$0xff] }
  0x50   :  { %879 = vxpose.xlu0.b32.cont [15/16] (narrow) %v878_v43, 16  ;;  %v255_v43 = vld [vmem:[#allocation2 + $0x2e8] sm:$0xff] }
  0x54   :  { %881 = vxpose.xlu0.b32.end [16/16] (narrow) %v880_v46, 16  ;;  %v303_v46 = vpack.c.bf16 %v255_v43, %v249_v41  ;;  %v251_v41 = vld [vmem:[#allocation2 + $0x2c8] sm:$0xff]  ;;  %v298_v43 = vpack.c.bf16 %v244_v40, %v238_v39 }
  0x98   :  { %v882_v47 = vpop.trf.xlu0 }
  0x99   :  { %v886_v48 = vunpack.i.h.bf16 %v882_v47  ;;  %v883_v50 = vunpack.i.l.bf16 %v882_v47  ;;  %v302_v47 = vpack.c.bf16 %v254_v45, %v248_v44  ;;  %v305_v44 = vpack.c.bf16 %v257_v42, %v251_v41  ;;  %v250_v45 = vld [vmem:[#allocation2 + $0x2c0] sm:$0xff] }
  0x9c   :  { %v887_v49 = vpop.trf.xlu0 }
  0x9d   :  { %v891_v53 = vunpack.i.h.bf16 %v887_v49  ;;  %v888_v54 = vunpack.i.l.bf16 %v887_v49  ;;  %v173_v49 = vld [vmem:[#allocation2 + $0x58] sm:$0xff] }
  0x9f   :  { %v136_v57 = vpack.c.bf16 %v888_v54, %v883_v50  ;;  %v137_v58 = vpack.c.bf16 %v891_v53, %v886_v48  ;;  %v167_v48 = vld [vmem:[#allocation2 + $0x28] sm:$0xff] }
  0xa0   :  { %v263_v50 = vpack.c.bf16 %v173_v49, %v167_v48  ;;  %v370_v48 = vlaneseq }
  0xa1   :  { %839 = vmatprep.mubr.bf16.mxu0 %v136_v57 }
  0xa2   :  { %840 = vmatmul.mubr.bf16.vlgmr.msra.gmra.mrb[0].mxu0 %v137_v58  ;;  %506 = vmatprep.subr.bf16.mxu1 %v263_v50  ;;  %v1179_v49 = vshrl.u32 %v370_v48, 7 }
  0xa3   :  { %454 = vmatpush1.bf16.msra.mxu0 %v260_v59  ;;  %485 = vmatprep.mubr.bf16.mxu0 %v967_v51 }
  0xa4   :  { %455 = vmatprep.subr.bf16.mxu0 %v267_v60  ;;  %v372_v50 = vsub.s32 0, %v1179_v49 }
  0xa7   :  { %456 = vmatpush1.bf16.msra.mxu0 %v266_v1  ;;  %v179_v1 = vld [vmem:[#allocation2 + $0x88] sm:$0xff] }
  0xa8   :  { %457 = vmatprep.subr.bf16.mxu0 %v273_v2  ;;  %v185_v2 = vld [vmem:[#allocation2 + $0xb8] sm:$0xff] }
  0xab   :  { %458 = vmatpush1.bf16.msra.mxu0 %v272_v7 }
  0xac   :  { %459 = vmatprep.subr.bf16.mxu0 %v279_v8  ;;  %v269_v8 = vpack.c.bf16 %v185_v2, %v179_v1 }
  0xaf   :  { %460 = vmatpush1.bf16.msra.mxu0 %v278_v13  ;;  %v268_v13 = vpack.c.bf16 %v184_v10, %v178_v9 }
  0xb0   :  { %461 = vmatprep.subr.bf16.mxu0 %v285_v14  ;;  %v275_v14 = vpack.c.bf16 %v197_v12, %v191_v11  ;;  %v695_v12 = vunpack.c.0.s8 %v694_v62 }
  0xb2   :  { %v1203_v21 = vsub.s32 %v695_v12, %v1179_v49 }
  0xb3   :  { %462 = vmatpush1.bf16.msra.mxu0 %v284_v19  ;;  %v274_v19 = vpack.c.bf16 %v196_v16, %v190_v15 }
  0xb4   :  { %463 = vmatprep.subr.bf16.mxu0 %v291_v20  ;;  %v281_v20 = vpack.c.bf16 %v209_v18, %v203_v17 }
  0xb7   :  { %464 = vmatpush1.bf16.msra.mxu0 %v290_v23  ;;  %v215_v23 = vld [vmem:[#allocation2 + $0x1a8] sm:$0xff] }
  0xb8   :  { %465 = vmatprep.subr.bf16.mxu0 %v297_v33  ;;  %v287_v26 = vpack.c.bf16 %v221_v24, %v215_v23  ;;  %v226_v33 = vld [vmem:[#allocation2 + $0x200] sm:$0xff] }
  0xb9   :  { %v292_v37 = vpack.c.bf16 %v232_v34, %v226_v33 }
  0xbb   :  { %466 = vmatpush1.bf16.msra.mxu0 %v296_v35  ;;  %v239_v35 = vld [vmem:[#allocation2 + $0x268] sm:$0xff] }
  0xbc   :  { %467 = vmatprep.subr.bf16.mxu0 %v303_v46  ;;  %v299_v38 = vpack.c.bf16 %v245_v36, %v239_v35  ;;  %v256_v46 = vld [vmem:[#allocation2 + $0x2f0] sm:$0xff] }
  0xbf   :  { %468 = vmatpush1.bf16.msra.mxu0 %v302_v47  ;;  %v304_v47 = vpack.c.bf16 %v256_v46, %v250_v45 }
 0x175   :  { %v841_v53 = vpop.f32.mrb[0].mxu0 }
 0x176   :  { %v356_v54 = vadd.f32 %v841_v53, %v812_v52  ;;  %v347_v55 = vpop.f32.mrb[1].mxu0  ;;  %v1186_v53 = vld [vmem:[%s1258_s4] sm:$0x3f]  ;;  %s969_s4 = smov [#allocation5]  }
 0x177   :  { %v348_v56 = vadd.f32 %v812_v52, %v347_v55  ;;  %v842_v57 = vpop.f32.mrb[2].mxu0  ;;  %v384_v55 = vsub.s32 3, %v1179_v49  ;;  %s770_s16 = sshll.u32 %s969_s4, 4  ;;  %s771_s16 = int_to_ptr.vmem [resolvable:$true] %s770_s16 }
 0x178   :  { %v359_v58 = vadd.f32 %v842_v57, %v812_v52  ;;  %v350_v59 = vpop.f32.mrb[3].mxu0  ;;  %v364_v63 = vmax.f32 %v356_v54, 0.0  ;;  %v376_v54 = vsub.s32 1, %v1179_v49  ;;  %s914_s17 = scalar_lea.vmem %s771_s16, 3072  ;;  %p919_p9 = scmp.lt.s32.totalorder %s771_s16, %s771_s16 }
 0x179   :  { %v351_v60 = vadd.f32 %v812_v52, %v350_v59  ;;  %v362_v3 = vmax.f32 %v348_v56, 0.0  ;;  %v380_v52 = vsub.s32 2, %v1179_v49  ;;  %p915_p8 = scmp.ne.s32.totalorder %s771_s16, %s914_s17  ;;  %p920_p10 = scmp.lt.s32.totalorder %s914_s17, %s914_s17 }
 0x17a   :  { %v365_v0 = vmax.f32 %v359_v58, 0.0  ;;  %v1193_v57 = vrot.slane %v1186_v53, %v376_v54  ;;  %v1196_v58 = vrot.slane %v1186_v53, %v384_v55 }
 0x17b   :  { %v363_v4 = vmax.f32 %v351_v60, 0.0  ;;  %v381_v56 = vrot.slane %v1186_v53, %v380_v52  ;;  %p921_p11 = por %p920_p10, %p919_p9 }
 0x17c   :  { %v1170_v5 = vpack.c.bf16 %v365_v0, %v364_v63 }
 0x17d   :  { %v366_v7 = vpack.c.bf16 %v363_v4, %v362_v3  ;;  %p922_p12 = pnand %p921_p11, %p915_p8 }
 0x17f   :  { %433 = vmatmul.mubr.bf16.vlgmr.msra.gmra.mrb[0].mxu1 %v366_v7  ;;  %486 = vmatmul.mubr.bf16.vlgmr.msra.gmra.mrb[4].mxu0 %v366_v7 }
 0x180   :  { %507 = vmatpush1.bf16.msra.mxu1 %v262_v6  ;;  %442 = vmatprep.mubr.bf16.mxu1 %v967_v51 }
 0x181   :  { %508 = vmatprep.subr.bf16.mxu1 %v269_v8  ;;  %495 = vmatprep.mubr.bf16.mxu0 %v967_v51 }
 0x184   :  { %509 = vmatpush1.bf16.msra.mxu1 %v268_v13 }
 0x185   :  { %510 = vmatprep.subr.bf16.mxu1 %v275_v14 }
 0x187   :  { %443 = vmatmul.mubr.bf16.gmra.mrb[4].mxu1 %v1170_v5  ;;  %496 = vmatmul.mubr.bf16.gmra.mrb[8].mxu0 %v1170_v5 }
 0x188   :  { %511 = vmatpush1.bf16.msra.mxu1 %v274_v19  ;;  %538 = vmatprep.mubr.bf16.mxu1 %v967_v51 }
 0x189   :  { %512 = vmatprep.subr.bf16.mxu1 %v281_v20 }
 0x18c   :  { %513 = vmatpush1.bf16.msra.mxu1 %v280_v25 }
 0x18d   :  { %514 = vmatprep.subr.bf16.mxu1 %v287_v26 }
 0x190   :  { %515 = vmatpush1.bf16.msra.mxu1 %v286_v31 }
 0x191   :  { %516 = vmatprep.subr.bf16.mxu1 %v293_v32 }
 0x194   :  { %517 = vmatpush1.bf16.msra.mxu1 %v292_v37 }
 0x195   :  { %518 = vmatprep.subr.bf16.mxu1 %v299_v38 }
 0x198   :  { %519 = vmatpush1.bf16.msra.mxu1 %v298_v43 }
 0x199   :  { %520 = vmatprep.subr.bf16.mxu1 %v305_v44 }
 0x19c   :  { %521 = vmatpush1.bf16.msra.mxu1 %v304_v47 }
 0x19f   :  { %539 = vmatmul.mubr.bf16.vlgmr.msra.gmra.mrb[8].mxu1 %v366_v7 }
 0x1a0   :  { %548 = vmatprep.mubr.bf16.mxu1 %v967_v51  ;;  %v373_v51 = vrot.slane %v1186_v53, %v372_v50 }
 0x1a7   :  { %549 = vmatmul.mubr.bf16.gmra.mrb[12].mxu1 %v1170_v5 }
 0x252   :  { %v434_v59 = vpop.f32.mrb[0].mxu1  ;;  %v487_v60 = vpop.f32.mrb[4].mxu0 }
 0x253   :  { %v435_v63 = vadd.f32 %v434_v59, %v373_v51  ;;  %v488_v0 = vadd.f32 %v487_v60, %v381_v56  ;;  %v436_v1 = vpop.f32.mrb[1].mxu1  ;;  %v489_v2 = vpop.f32.mrb[5].mxu0 }
 0x254   :  { %v437_v3 = vadd.f32 %v436_v1, %v1193_v57  ;;  %v490_v4 = vadd.f32 %v489_v2, %v1196_v58  ;;  %v438_v5 = vpop.f32.mrb[2].mxu1  ;;  %v491_v6 = vpop.f32.mrb[6].mxu0 }
 0x255   :  { %559 = vst [vmem:[#allocation5] sm:$0xff] %v435_v63  ;;  %561 = vst [vmem:[#allocation5 + $0x10] sm:$0xff] %v488_v0  ;;  %v439_v7 = vadd.f32 %v438_v5, %v373_v51  ;;  %v492_v8 = vadd.f32 %v491_v6, %v381_v56  ;;  %v440_v9 = vpop.f32.mrb[3].mxu1  ;;  %v493_v10 = vpop.f32.mrb[7].mxu0 }
 0x256   :  { %560 = vst [vmem:[#allocation5 + $0x8] sm:$0xff] %v437_v3  ;;  %562 = vst [vmem:[#allocation5 + $0x18] sm:$0xff] %v490_v4  ;;  %v441_v11 = vadd.f32 %v440_v9, %v1193_v57  ;;  %v494_v13 = vadd.f32 %v493_v10, %v1196_v58 }
 0x257   :  { %565 = vst [vmem:[#allocation5 + $0x30] sm:$0xff] %v439_v7  ;;  %v583_v14 = vadd.f32 %v439_v7, %v435_v63  ;;  %567 = vst [vmem:[#allocation5 + $0x40] sm:$0xff] %v492_v8  ;;  %v597_v15 = vadd.f32 %v492_v8, %v488_v0 }
 0x258   :  { %566 = vst [vmem:[#allocation5 + $0x38] sm:$0xff] %v441_v11  ;;  %v590_v16 = vadd.f32 %v441_v11, %v437_v3  ;;  %568 = vst [vmem:[#allocation5 + $0x48] sm:$0xff] %v494_v13  ;;  %v604_v17 = vadd.f32 %v494_v13, %v490_v4 }
 0x259   :  { %v584_v18 = vrot.slane %v583_v14, 4  ;;  %v598_v19 = vrot.slane %v597_v15, 4 }
 0x25a   :  { %v591_v20 = vrot.slane %v590_v16, 4  ;;  %v605_v22 = vrot.slane %v604_v17, 4  ;;  %v444_v23 = vpop.f32.mrb[4].mxu1  ;;  %v497_v24 = vpop.f32.mrb[8].mxu0 }
 0x25b   :  { %v585_v25 = vadd.f32 %v584_v18, %v583_v14  ;;  %v599_v26 = vadd.f32 %v598_v19, %v597_v15  ;;  %v445_v27 = vadd.f32 %v444_v23, %v373_v51  ;;  %v498_v28 = vadd.f32 %v497_v24, %v381_v56  ;;  %v446_v29 = vpop.f32.mrb[5].mxu1  ;;  %v499_v30 = vpop.f32.mrb[9].mxu0 }
 0x25c   :  { %v592_v31 = vadd.f32 %v591_v20, %v590_v16  ;;  %v606_v32 = vadd.f32 %v605_v22, %v604_v17  ;;  %v447_v33 = vadd.f32 %v446_v29, %v1193_v57  ;;  %v500_v34 = vadd.f32 %v499_v30, %v1196_v58  ;;  %v448_v35 = vpop.f32.mrb[6].mxu1  ;;  %v501_v36 = vpop.f32.mrb[10].mxu0 }
 0x25d   :  { %v586_v37 = vrot.slane %v585_v25, 2  ;;  %v600_v38 = vrot.slane %v599_v26, 2  ;;  %571 = vst [vmem:[#allocation5 + $0x60] sm:$0xff] %v445_v27  ;;  %573 = vst [vmem:[#allocation5 + $0x70] sm:$0xff] %v498_v28  ;;  %v449_v39 = vadd.f32 %v448_v35, %v373_v51  ;;  %v502_v40 = vadd.f32 %v501_v36, %v381_v56  ;;  %v450_v41 = vpop.f32.mrb[7].mxu1  ;;  %v503_v42 = vpop.f32.mrb[11].mxu0 }
 0x25e   :  { %v593_v43 = vrot.slane %v592_v31, 2  ;;  %v607_v44 = vrot.slane %v606_v32, 2  ;;  %572 = vst [vmem:[#allocation5 + $0x68] sm:$0xff] %v447_v33  ;;  %574 = vst [vmem:[#allocation5 + $0x78] sm:$0xff] %v500_v34  ;;  %v451_v45 = vadd.f32 %v450_v41, %v1193_v57  ;;  %v504_v46 = vadd.f32 %v503_v42, %v1196_v58 }
 0x25f   :  { %v587_v47 = vadd.f32 %v586_v37, %v585_v25  ;;  %v601_v48 = vadd.f32 %v600_v38, %v599_v26  ;;  %577 = vst [vmem:[#allocation5 + $0x90] sm:$0xff] %v449_v39  ;;  %v625_v50 = vadd.f32 %v449_v39, %v445_v27  ;;  %579 = vst [vmem:[#allocation5 + $0xa0] sm:$0xff] %v502_v40  ;;  %v392_v36 = vsub.s32 5, %v1179_v49 }
 0x260   :  { %v639_v52 = vadd.f32 %v502_v40, %v498_v28  ;;  %v594_v54 = vadd.f32 %v593_v43, %v592_v31  ;;  %v608_v55 = vadd.f32 %v607_v44, %v606_v32  ;;  %578 = vst [vmem:[#allocation5 + $0x98] sm:$0xff] %v451_v45  ;;  %v632_v51 = vadd.f32 %v451_v45, %v447_v33 }
 0x261   :  { %580 = vst [vmem:[#allocation5 + $0xa8] sm:$0xff] %v504_v46  ;;  %v646_v56 = vadd.f32 %v504_v46, %v500_v34  ;;  %v588_v59 = vrot.slane %v587_v47, 1  ;;  %v602_v60 = vrot.slane %v601_v48, 1  ;;  %v626_v61 = vrot.slane %v625_v50, 4 }
 0x262   :  { %v640_v62 = vrot.slane %v639_v52, 4  ;;  %v595_v63 = vrot.slane %v594_v54, 1  ;;  %v609_v57 = vrot.slane %v608_v55, 1  ;;  %v633_v0 = vrot.slane %v632_v51, 4 }
 0x263   :  { %v647_v58 = vrot.slane %v646_v56, 4  ;;  %v589_v1 = vadd.f32 %v588_v59, %v587_v47  ;;  %v603_v2 = vadd.f32 %v602_v60, %v601_v48  ;;  %v627_v3 = vadd.f32 %v626_v61, %v625_v50 }
 0x264   :  { %v641_v4 = vadd.f32 %v640_v62, %v639_v52  ;;  %v596_v5 = vadd.f32 %v595_v63, %v594_v54  ;;  %v610_v6 = vadd.f32 %v609_v57, %v608_v55  ;;  %v634_v7 = vadd.f32 %v633_v0, %v632_v51 }
 0x265   :  { %v648_v8 = vadd.f32 %v647_v58, %v646_v56  ;;  %v667_v9 = vmul.f32 0.0625, %v589_v1  ;;  %v669_v10 = vmul.f32 0.0625, %v603_v2  ;;  %v628_v11 = vrot.slane %v627_v3, 2 }
 0x266   :  { %v642_v12 = vrot.slane %v641_v4, 2  ;;  %v668_v13 = vmul.f32 0.0625, %v596_v5  ;;  %v670_v14 = vmul.f32 0.0625, %v610_v6  ;;  %v635_v15 = vrot.slane %v634_v7, 2 }
 0x267   :  { %v649_v16 = vrot.slane %v648_v8, 2  ;;  %v629_v17 = vadd.f32 %v628_v11, %v627_v3  ;;  %v388_v32 = vsub.s32 4, %v1179_v49  ;;  %v393_v44 = vrot.slane %v1186_v53, %v392_v36 }
 0x268   :  { %v643_v18 = vadd.f32 %v642_v12, %v641_v4  ;;  %v691_v19 = vcombine.low %v667_v9, %v668_v13  ;;  %v692_v20 = vcombine.low %v669_v10, %v670_v14  ;;  %v636_v22 = vadd.f32 %v635_v15, %v634_v7 }
 0x269   :  { %v650_v23 = vadd.f32 %v649_v16, %v648_v8  ;;  %v630_v24 = vrot.slane %v629_v17, 1  ;;  %v389_v41 = vrot.slane %v1186_v53, %v388_v32 }
 0x26a   :  { %v644_v25 = vrot.slane %v643_v18, 1  ;;  %v699_v26 = vrot.slane %v691_v19, %v1203_v21  ;;  %v706_v27 = vrot.slane %v692_v20, %v1203_v21  ;;  %v637_v28 = vrot.slane %v636_v22, 1 }
 0x26b   :  { %v651_v29 = vrot.slane %v650_v23, 1  ;;  %v631_v30 = vadd.f32 %v630_v24, %v629_v17 }
 0x26c   :  { %v645_v31 = vadd.f32 %v644_v25, %v643_v18  ;;  %v707_v33 = vcombine.low %v699_v26, %v706_v27  ;;  %v638_v34 = vadd.f32 %v637_v28, %v636_v22 }
 0x26d   :  { %v652_v35 = vadd.f32 %v651_v29, %v650_v23  ;;  %v673_v37 = vmul.f32 0.0625, %v631_v30 }
 0x26e   :  { %v675_v38 = vmul.f32 0.0625, %v645_v31  ;;  %v674_v39 = vmul.f32 0.0625, %v638_v34 }
 0x26f   :  { %v676_v40 = vmul.f32 0.0625, %v652_v35 }
 0x270   :  { %v716_v42 = vcombine.low %v673_v37, %v674_v39 }
 0x271   :  { %v717_v43 = vcombine.low %v675_v38, %v676_v40 }
 0x272   :  { %v724_v45 = vrot.slane %v716_v42, %v1203_v21  ;;  %v540_v47 = vpop.f32.mrb[8].mxu1 }
 0x273   :  { %v731_v46 = vrot.slane %v717_v43, %v1203_v21  ;;  %v541_v48 = vadd.f32 %v540_v47, %v389_v41  ;;  %v542_v50 = vpop.f32.mrb[9].mxu1 }
 0x274   :  { %v543_v52 = vadd.f32 %v542_v50, %v393_v44  ;;  %v544_v54 = vpop.f32.mrb[10].mxu1 }
 0x275   :  { %v732_v49 = vcombine.low %v724_v45, %v731_v46  ;;  %563 = vst [vmem:[#allocation5 + $0x20] sm:$0xff] %v541_v48  ;;  %v545_v55 = vadd.f32 %v544_v54, %v389_v41  ;;  %v546_v51 = vpop.f32.mrb[11].mxu1 }
 0x276   :  { %564 = vst [vmem:[#allocation5 + $0x28] sm:$0xff] %v543_v52  ;;  %v547_v56 = vadd.f32 %v546_v51, %v393_v44 }
 0x277   :  { %v745_v59 = vrot.slane %v732_v49, 7  ;;  %569 = vst [vmem:[#allocation5 + $0x50] sm:$0xff] %v545_v55  ;;  %v611_v53 = vadd.f32 %v545_v55, %v541_v48 }
 0x278   :  { %570 = vst [vmem:[#allocation5 + $0x58] sm:$0xff] %v547_v56  ;;  %v618_v60 = vadd.f32 %v547_v56, %v543_v52 }
 0x279   :  { %v747_v61 = vsel %vm746_vm0, %v745_v59, %v707_v33  ;;  %v612_v62 = vrot.slane %v611_v53, 4 }
 0x27a   :  { %v749_v63 = vsel %vm748_vm1, %v745_v59, %v747_v61  ;;  %v619_v57 = vrot.slane %v618_v60, 4  ;;  %v550_v0 = vpop.f32.mrb[12].mxu1 }
 0x27b   :  { %v751_v58 = vsel %vm750_vm2, %v745_v59, %v749_v63  ;;  %v613_v1 = vadd.f32 %v612_v62, %v611_v53  ;;  %v551_v2 = vadd.f32 %v550_v0, %v389_v41  ;;  %v552_v3 = vpop.f32.mrb[13].mxu1 }
 0x27c   :  { %v753_v4 = vsel %vm752_vm3, %v745_v59, %v751_v58  ;;  %v620_v5 = vadd.f32 %v619_v57, %v618_v60  ;;  %v553_v6 = vadd.f32 %v552_v3, %v393_v44  ;;  %v554_v7 = vpop.f32.mrb[14].mxu1 }
 0x27d   :  { %763 = vst [vmem:[#allocation6] sm:$0xff] %v753_v4  ;;  %v614_v8 = vrot.slane %v613_v1, 2  ;;  %575 = vst [vmem:[#allocation5 + $0x80] sm:$0xff] %v551_v2  ;;  %v555_v9 = vadd.f32 %v554_v7, %v389_v41  ;;  %v556_v10 = vpop.f32.mrb[15].mxu1 }
 0x27e   :  { %v621_v11 = vrot.slane %v620_v5, 2  ;;  %576 = vst [vmem:[#allocation5 + $0x88] sm:$0xff] %v553_v6  ;;  %v557_v12 = vadd.f32 %v556_v10, %v393_v44 }
 0x27f   :  { %v615_v13 = vadd.f32 %v614_v8, %v613_v1  ;;  %581 = vst [vmem:[#allocation5 + $0xb0] sm:$0xff] %v555_v9  ;;  %v653_v14 = vadd.f32 %v555_v9, %v551_v2 }
 0x280   :  { %v622_v15 = vadd.f32 %v621_v11, %v620_v5  ;;  %582 = vst [vmem:[#allocation5 + $0xb8] sm:$0xff] %v557_v12  ;;  %v660_v16 = vadd.f32 %v557_v12, %v553_v6 }
 0x281   :  { %v616_v17 = vrot.slane %v615_v13, 1  ;;  %v654_v18 = vrot.slane %v653_v14, 4 }
 0x282   :  { %925 = shalt.err (!%p922_p12)
}
 0x283   :  { %s926_s3 = scalar_lea.hbm %s1259_s5, 3072 }
 0x284   :  { %p927_p13 = scmp.ne.s32.totalorder %s1259_s5, %s926_s3  ;;  %p930_p0 = scmp.lt.u32.totalorder %s926_s3, %s1259_s5 }
 0x286   :  { %p932_p1 = pnand %p930_p0, %p927_p13 }
 0x288   :  { %935 = shalt.err (!%p932_p1)
}
 0x289   :  { %776 = dma.vmem_to_hbm [thread:$0]  %s771_s16, 3072, %s1259_s5, [#allocation4], %s965_s7, %s965_s7, %s966_s8   ;;  %v623_v19 = vrot.slane %v622_v15, 1  ;;  %v661_v20 = vrot.slane %v660_v16, 4  ;;  %v617_v22 = vadd.f32 %v616_v17, %v615_v13  ;;  %v655_v23 = vadd.f32 %v654_v18, %v653_v14 }
 0x28a   :  { %s970_s5 = smov [#allocation6]  }
 0x28b   :  { %v624_v24 = vadd.f32 %v623_v19, %v622_v15  ;;  %v662_v25 = vadd.f32 %v661_v20, %v660_v16  ;;  %v671_v26 = vmul.f32 0.0625, %v617_v22  ;;  %v656_v27 = vrot.slane %v655_v23, 2  ;;  %s783_s7 = sshll.u32 %s970_s5, 4  ;;  %s784_s7 = int_to_ptr.vmem [resolvable:$true] %s783_s7 }
 0x28c   :  { %s936_s8 = scalar_lea.vmem %s784_s7, 192  ;;  %p941_p3 = scmp.lt.s32.totalorder %s784_s7, %s784_s7 }
 0x28d   :  { %v672_v28 = vmul.f32 0.0625, %v624_v24  ;;  %v663_v29 = vrot.slane %v662_v25, 2  ;;  %v657_v30 = vadd.f32 %v656_v27, %v655_v23  ;;  %p937_p2 = scmp.ne.s32.totalorder %s784_s7, %s936_s8  ;;  %p942_p4 = scmp.lt.s32.totalorder %s936_s8, %s936_s8 }
 0x28f   :  { %v708_v31 = vcombine.low %v671_v26, %v672_v28  ;;  %v664_v32 = vadd.f32 %v663_v29, %v662_v25  ;;  %v658_v33 = vrot.slane %v657_v30, 1  ;;  %p943_p5 = por %p942_p4, %p941_p3 }
 0x291   :  { %v665_v34 = vrot.slane %v664_v32, 1  ;;  %v659_v35 = vadd.f32 %v658_v33, %v657_v30  ;;  %v715_v41 = vrot.slane %v708_v31, %v1203_v21  ;;  %p944_p6 = pnand %p943_p5, %p937_p2 }
 0x293   :  { %v666_v36 = vadd.f32 %v665_v34, %v664_v32  ;;  %v677_v37 = vmul.f32 0.0625, %v659_v35 }
 0x295   :  { %v678_v38 = vmul.f32 0.0625, %v666_v36 }
 0x297   :  { %v733_v39 = vcombine.low %v677_v37, %v678_v38 }
 0x299   :  { %v740_v40 = vrot.slane %v733_v39, %v1203_v21 }
 0x29b   :  { %v756_v42 = vrot.slane %v740_v40, 7 }
 0x29d   :  { %v757_v43 = vsel %vm746_vm0, %v756_v42, %v715_v41 }
 0x29e   :  { %v758_v44 = vsel %vm748_vm1, %v756_v42, %v757_v43 }
 0x29f   :  { %v759_v45 = vsel %vm750_vm2, %v756_v42, %v758_v44 }
 0x2a0   :  { %v760_v46 = vsel %vm752_vm3, %v756_v42, %v759_v45 }
 0x2a1   :  { %764 = vst [vmem:[#allocation6 + $0x8] sm:$0xf] %v760_v46 }
 0x2a2   :  { %947 = shalt.err (!%p944_p6)
}
 0x2a3   :  { %s948_s27 = scalar_lea.hbm %s1260_s6, 192 }
 0x2a4   :  { %p949_p7 = scmp.ne.s32.totalorder %s1260_s6, %s948_s27  ;;  %p952_p8 = scmp.lt.u32.totalorder %s948_s27, %s1260_s6 }
 0x2a6   :  { %p954_p9 = pnand %p952_p8, %p949_p7 }
 0x2a8   :  { %957 = shalt.err (!%p954_p9)
}
 0x2a9   :  { %786 = dma.vmem_to_hbm [thread:$0]  %s784_s7, 192, %s1260_s6, [#allocation7]  }
 0x2aa   :  { %960 = dma.done.wait [#allocation4], 3072  }
 0x2ab   :  { %961 = vsyncadd [#allocation4], 4294964224 }
 0x2ac   :  { %962 = dma.done.wait [#allocation7], 192  }
 0x2ad   :  { %963 = vsyncadd [#allocation7], 4294967104 }
 0x2ae   :  { %793 = vsyncpa [#allocation3], 1 }
 0x2af   :  { %794 = vsyncpa [#allocation4], 1 }
 0x2b0   :  { %795 = vsyncpa [#allocation7], 1 }

</bundles_post_ra>
